<compile_context>
chip_gen: v5e
topology: v5e:2x2
jax: 0.10.0
libtpu: 0.0.40
codegen_flags: <defaults>
</compile_context>

<pallas_src>
import functools

import jax
import jax.numpy as jnp
import numpy as np
from jax import lax
from jax.experimental import pallas as pl
from jax.experimental.pallas import tpu as pltpu


def _round_up(v, m):
    return (v + m - 1) // m * m


def _layer_norm_kernel(x_ref, g_ref, o_ref, *, eps, stable, true_d, inv_d):
    x = x_ref[...].astype(jnp.float32)                    # (TR, D_pad), lane-major
    d_pad = x.shape[-1]
    padded = d_pad != true_d
    if padded:
        lane = lax.broadcasted_iota(jnp.int32, x.shape, dimension=1)
        lane_mask = lane < true_d

    if stable:
        x_for_max = jnp.where(lane_mask, x, -jnp.inf) if padded else x
        amax = jnp.max(x_for_max, axis=-1, keepdims=True)  # XLU lane reduction
        # One EUP reciprocal per row + one VPU multiply (no per-element divide).
        x = x * pl.reciprocal(amax)

    if padded:
        # Keep padded lanes out of the sums (also re-zeroes them after scaling).
        x = jnp.where(lane_mask, x, 0.0)

    # Fused single-pass statistics (f32 accumulation).
    s = jnp.sum(x, axis=-1, keepdims=True)                 # XLU
    sq = jnp.sum(x * x, axis=-1, keepdims=True)            # VPU + XLU
    mean = s * inv_d
    # E[x^2] - mean^2 can cancel for large-mean inputs; clamp at 0 for safety.
    var = jnp.maximum(sq * inv_d - mean * mean, 0.0)
    inv = lax.rsqrt(var + eps)                             # EUP slot, ~free
    o_ref[...] = ((x - mean) * inv * g_ref[...]).astype(o_ref.dtype)


def _vmem_limit_bytes():
    try:
        cap = int(pltpu.get_tpu_info().vmem_capacity_bytes)
    except Exception:
        cap = 64 << 20  # conservative fallback: v7x per-TensorCore VMEM
    # v5e/v6e (128 MiB): 64 MiB scoped limit; v7x (64 MiB): 48 MiB.
    return min(3 * cap // 4, 64 << 20)


def layer_norm(x, g, *, stable=False, block_rows=None):
    """x: (..., D). g: (D,). Normalizes over the last dim (matches the PyTorch module)."""
    orig_shape = x.shape
    D = int(orig_shape[-1])
    R = 1
    for s in orig_shape[:-1]:
        R *= int(s)
    if R == 0 or D == 0:
        return x  # empty tensor: nothing to normalize

    eps = 1e-5 if x.dtype == jnp.float32 else 1e-3
    itemsize = int(jnp.dtype(x.dtype).itemsize)

    x2 = x.reshape(R, D)
    g2 = g.reshape(1, D).astype(jnp.float32)

    # Lane-dense layout: pad features to a multiple of 128 only when ragged;
    # padded lanes are masked inside the kernel (reductions divide by true D).
    D_pad = _round_up(D, 128)
    if D_pad != D:
        x2 = jnp.pad(x2, ((0, 0), (0, D_pad - D)))
        g2 = jnp.pad(g2, ((0, 0), (0, D_pad - D)))

    vmem_limit = _vmem_limit_bytes()

    if block_rows is None:
        # Memory-bound op: input tile of ~vmem_limit/8 bytes (in the *input* dtype)
        # leaves room for double-buffered in+out plus f32 intermediates.
        budget_bytes = vmem_limit // 8
        block_rows = max(8, (budget_bytes // (D_pad * itemsize)) // 8 * 8)

    # Guarantee a multi-step grid: both v7x TensorCores need >=2 steps of a
    # "parallel" axis, and >=2 steps is also what enables DMA/compute overlap.
    target_steps = 4 if R >= 32 else (2 if R >= 16 else 1)
    step_cap = _round_up(-(-R // target_steps), 8)
    block_rows = max(8, min(block_rows, step_cap))
    block_rows = (block_rows // 8) * 8

    grid = (pl.cdiv(R, block_rows),)

    cost = pl.CostEstimate(
        flops=int(7 * R * D_pad),
        transcendentals=int(R),
        bytes_accessed=int(2 * R * D_pad * itemsize + D_pad * 4),
    )

    out = pl.pallas_call(
        functools.partial(
            _layer_norm_kernel,
            eps=eps,
            stable=stable,
            true_d=D,
            inv_d=1.0 / D,
        ),
        out_shape=jax.ShapeDtypeStruct((R, D_pad), x.dtype),
        grid_spec=pltpu.PrefetchScalarGridSpec(
            num_scalar_prefetch=0,
            grid=grid,
            in_specs=[
                pl.BlockSpec((block_rows, D_pad), lambda i: (i, 0)),  # x row tile
                pl.BlockSpec((1, D_pad), lambda i: (0, 0)),           # g (lane-resident)
            ],
            out_specs=pl.BlockSpec((block_rows, D_pad), lambda i: (i, 0)),
        ),
        compiler_params=pltpu.CompilerParams(
            dimension_semantics=("parallel",),
            vmem_limit_bytes=int(vmem_limit),
        ),
        cost_estimate=cost,
    )(x2, g2)

    if D_pad != D:
        out = out[:, :D]
    return out.reshape(orig_shape)


def reference_layer_norm(x, g, *, stable=False):
    """Pure-JAX reference matching the PyTorch forward."""
    eps = 1e-5 if x.dtype == jnp.float32 else 1e-3
    if stable:
        x = x / jnp.max(x, axis=-1, keepdims=True)
    mean = jnp.mean(x, axis=-1, keepdims=True)
    var = jnp.mean((x - mean) ** 2, axis=-1, keepdims=True)
    return (x - mean) * lax.rsqrt(var + eps) * g


if __name__ == "__main__":
    key = jax.random.PRNGKey(0)
    kx, kg, kx2, kg2 = jax.random.split(key, 4)

    # LayerNorm over the feature (last) dim: batch=2, seq=8, dim=256.
    B, S, D = 2, 8, 256
    x = jax.random.normal(kx, (B, S, D), jnp.float32)
    # PyTorch initializes g to ones; perturb so the gain multiply is exercised.
    g = 1.0 + 0.1 * jax.random.normal(kg, (D,), jnp.float32)

    out = jax.block_until_ready(layer_norm(x, g, stable=False))
    ref = reference_layer_norm(x, g, stable=False)
    np.testing.assert_allclose(np.asarray(out), np.asarray(ref), rtol=1e-5, atol=1e-5)
    assert out.shape == x.shape

    out_s = jax.block_until_ready(layer_norm(x, g, stable=True))
    ref_s = reference_layer_norm(x, g, stable=True)
    np.testing.assert_allclose(np.asarray(out_s), np.asarray(ref_s), rtol=1e-5, atol=1e-5)

    # Ragged feature dim (not a multiple of 128) exercises the lane-mask path.
    Dr = 96
    xr = jax.random.normal(kx2, (B, S, Dr), jnp.float32)
    gr = 1.0 + 0.1 * jax.random.normal(kg2, (Dr,), jnp.float32)
    out_r = jax.block_until_ready(layer_norm(xr, gr, stable=True))
    ref_r = reference_layer_norm(xr, gr, stable=True)
    np.testing.assert_allclose(np.asarray(out_r), np.asarray(ref_r), rtol=1e-5, atol=1e-5)

    print("KERNEL_OK")
</pallas_src>

<mosaic_0001>
module attributes {stable_mosaic.version = 11 : i64} {
  func.func @_layer_norm_kernel(%arg0: i32, %arg1: memref<8x256xf32, #tpu.memory_space<vmem>>, %arg2: memref<1x256xf32, #tpu.memory_space<vmem>>, %arg3: memref<8x256xf32, #tpu.memory_space<vmem>>) attributes {dimension_semantics = [#tpu.dimension_semantics<parallel>], iteration_bounds = array<i64: 2>, scalar_prefetch = 0 : i64, scratch_operands = 0 : i64, tpu.core_type = #tpu.core_type<tc>, window_params = [{transform_indices = @transform_0, window_bounds = array<i64: 8, 256>}, {pipeline_mode = #tpu.pipeline_mode<synchronous>, transform_indices = @transform_1, window_bounds = array<i64: 1, 256>}, {transform_indices = @transform_2, window_bounds = array<i64: 8, 256>}]} {
    %c0 = arith.constant 0 : index
    %c0_0 = arith.constant 0 : index
    %0 = vector.load %arg1[%c0, %c0_0] : memref<8x256xf32, #tpu.memory_space<vmem>>, vector<8x256xf32>
    %cst = arith.constant dense<0.000000e+00> : vector<8xf32>
    %1 = vector.multi_reduction <add>, %0, %cst [1] : vector<8x256xf32> to vector<8xf32>
    %2 = vector.shape_cast %1 : vector<8xf32> to vector<8x1xf32>
    %3 = arith.mulf %0, %0 : vector<8x256xf32>
    %cst_1 = arith.constant dense<0.000000e+00> : vector<8xf32>
    %4 = vector.multi_reduction <add>, %3, %cst_1 [1] : vector<8x256xf32> to vector<8xf32>
    %5 = vector.shape_cast %4 : vector<8xf32> to vector<8x1xf32>
    %cst_2 = arith.constant 3.906250e-03 : f32
    %6 = vector.broadcast %cst_2 : f32 to vector<8x1xf32>
    %7 = arith.mulf %2, %6 : vector<8x1xf32>
    %cst_3 = arith.constant 3.906250e-03 : f32
    %8 = vector.broadcast %cst_3 : f32 to vector<8x1xf32>
    %9 = arith.mulf %5, %8 : vector<8x1xf32>
    %10 = arith.mulf %7, %7 : vector<8x1xf32>
    %11 = arith.subf %9, %10 : vector<8x1xf32>
    %cst_4 = arith.constant 0.000000e+00 : f32
    %12 = vector.broadcast %cst_4 : f32 to vector<8x1xf32>
    %13 = arith.maximumf %11, %12 : vector<8x1xf32>
    %cst_5 = arith.constant 9.99999974E-6 : f32
    %14 = vector.broadcast %cst_5 : f32 to vector<8x1xf32>
    %15 = arith.addf %13, %14 : vector<8x1xf32>
    %16 = math.rsqrt %15 : vector<8x1xf32>
    %17 = vector.broadcast %7 : vector<8x1xf32> to vector<8x256xf32>
    %18 = arith.subf %0, %17 : vector<8x256xf32>
    %19 = vector.broadcast %16 : vector<8x1xf32> to vector<8x256xf32>
    %20 = arith.mulf %18, %19 : vector<8x256xf32>
    %c0_6 = arith.constant 0 : index
    %c0_7 = arith.constant 0 : index
    %21 = vector.load %arg2[%c0_6, %c0_7] : memref<1x256xf32, #tpu.memory_space<vmem>>, vector<1x256xf32>
    %22 = vector.broadcast %21 : vector<1x256xf32> to vector<8x256xf32>
    %23 = arith.mulf %20, %22 : vector<8x256xf32>
    %c0_8 = arith.constant 0 : index
    %c0_9 = arith.constant 0 : index
    %24 = vector.load %arg3[%c0_8, %c0_9] : memref<8x256xf32, #tpu.memory_space<vmem>>, vector<8x256xf32>
    tpu.vector_store %arg3[%c0_8, %c0_9], %23 {strides = array<i32>} : memref<8x256xf32, #tpu.memory_space<vmem>>, vector<8x256xf32>,
    return
  }
  func.func @transform_0(%arg0: i32) -> (i32, i32) {
    %c0_i32 = arith.constant 0 : i32
    %c0_i32_0 = arith.constant 0 : i32
    return %arg0, %c0_i32 : i32, i32
  }
  func.func @transform_1(%arg0: i32) -> (i32, i32) {
    %c0_i32 = arith.constant 0 : i32
    %c0_i32_0 = arith.constant 0 : i32
    %c0_i32_1 = arith.constant 0 : i32
    return %c0_i32, %c0_i32_0 : i32, i32
  }
  func.func @transform_2(%arg0: i32) -> (i32, i32) {
    %c0_i32 = arith.constant 0 : i32
    %c0_i32_0 = arith.constant 0 : i32
    return %arg0, %c0_i32 : i32, i32
  }
}

</mosaic_0001>

<bundles_post_ra>
// kernel: tpu_custom_call.1
= control target key start
LH: loop header
LB: loop body
LE: loop exit
PB: predicated region body
PF: predicated region fallthrough
CT: control target
= control target key end

     0   :  { %7 = vsyncpa [#allocation3], 0  ;;  %s681_s0 = inlined_call_operand.hbm [shape: f32[16,256], index: 0, kind: input, shape index: {}]   ;;  %s682_s1 = inlined_call_operand.hbm [shape: f32[1,256], index: 1, kind: input, shape index: {}]   ;;  %s683_s2 = inlined_call_operand.hbm [shape: f32[16,256], index: 2, kind: output, shape index: {}]  }
   0x1   :  { %9 = vsyncpa [#allocation3 + $0x1], 0 }
   0x2   :  { %10 = vsyncpa [#allocation6], 0 }
   0x3   :  { %11 = vsyncpa [#allocation4], 0 }
   0x4   :  { %13 = vsyncpa [#allocation4 + $0x1], 0  ;;  %s539_s9 = smov 0   ;;  %s541_s10 = smov 0  }
   0x5   :  { %s543_s11 = smov 0   ;;  %s545_s12 = smov 0  }
   0x6 LB: > { %s560_s13 = sadd.s32 4294967295, %s521_s12   ;;  %s314_s14 = sadd.s32 4294967294, %s521_s12   ;;  %s521_s12 = sphi %s545_s12, %s693_s12   ;;  %s517_s11 = sphi %s543_s11, %s692_s11   ;;  %s513_s10 = sphi %s541_s10, %s691_s10   ;;  %s509_s9 = sphi %s539_s9, %s690_s9  }
   0x7   : > { %p39_p0 = scmp.ne.s32.totalorder %s513_s10, %s509_s9  ;;  %p40_p1 = scmp.eq.s32.totalorder %s560_s13, 0 }
   0x8   : > { %p84_p2 = scmp.eq.s32.totalorder %s560_s13, 1  ;;  %p90_p3 = scmp.eq.s32.totalorder %s314_s14, 1 }
   0x9   : > { %p569_p4 = por %p40_p1, %p39_p0  ;;  %p315_p5 = scmp.ge.s32.totalorder %s521_s12, 1 }
   0xa   : > { %p574_p6 = por %p90_p3, %p39_p0  ;;  %p97_p7 = scmp.lt.s32.totalorder %s521_s12, 3 }
   0xb   : > { %s109_s19 = sshll.u32 %s682_s1, 4  ;;  %s523_s21 = smov [#allocation5]   ;;  %s110_s19 = int_to_ptr.hbm [resolvable:$true] %s109_s19 }
   0xc   : > { %p582_p8 = pnand %p315_p5, %p97_p7  ;;  %s111_s22 = sshll.u32 %s523_s21, 4  ;;  %s112_s22 = int_to_ptr.vmem [resolvable:$true] %s111_s22 }
   0xd   : > { %s592_s23 = sadd.s32 1, %s521_s12   ;;  %s26_s24 = sadd.s32 1, %s517_s11 }
   0xe   : > { %p340_p10 = pneg %p582_p8  ;;  %s23_s25 = ssub.s32 %s521_s12, %s592_s23 }
   0xf   : > { %p24_p12 = scmp.eq.s32.totalorder %s23_s25, 0  ;;  %p33_p13 = scmp.ne.s32.totalorder %s517_s11, %s513_s10 }
  0x10   : > { %p341_p11 = pnand %p340_p10, %p40_p1  ;;  %p34_p0 = scmp.eq.s32.totalorder %s521_s12, 0 }
  0x11   : > { %s601_s26 = scalar_select %p24_p12, %s517_s11, %s26_s24  }
  0x12   : > { %343 = dma.hbm_to_vmem [thread:$0]  (!%p341_p11), %s110_s19, 32, %s112_s22, [#allocation6]  }
  0x13   : > { %p605_p3 = por %p84_p2, %p33_p13  ;;  %p353_p5 = scmp.lt.s32.totalorder %s521_s12, 2 }
  0x14   : > { %s122_s28 = sand.u32 1, %s517_s11   ;;  %s330_s29 = sshll.u32 %s521_s12, 4 }
  0x15   : > { %p35_p7 = por %p34_p0, %p33_p13  ;;  %s318_s30 = sshll.u32 %s122_s28, 4 }
  0x16   : > { %s131_s5 = scalar_lea.hbm %s681_s0, %s330_s29  ;;  %s126_s7 = scalar_lea.vmem [#allocation2], %s318_s30 }
  0x17   : > { %s133_s6 = sshll.u32 %s131_s5, 4  ;;  %s135_s8 = sshll.u32 %s126_s7, 4  ;;  %s134_s6 = int_to_ptr.hbm [resolvable:$true] %s133_s6  ;;  %s136_s8 = int_to_ptr.vmem [resolvable:$true] %s135_s8 }
  0x18   : > { %p615_p10 = pnand %p353_p5, %p35_p7  ;;  %s123_s17 = scalar_lea.sflag [#allocation3], %s122_s28 }
  0x19   : > { %s421_s18 = sshra.s32 %s134_s6, 4  ;;  %s428_s24 = scalar_lea.hbm %s681_s0, 32  ;;  %s422_s18 = int_to_ptr.hbm [resolvable:$true] %s421_s18 }
  0x1a   : > { %s423_s19 = scalar_lea.hbm %s422_s18, 16  ;;  %p425_p11 = pneg %p615_p10 }
  0x1b   : > { %p424_p2 = scmp.ne.s32.totalorder %s422_s18, %s423_s19  ;;  %p429_p0 = scmp.lt.s32.totalorder %s422_s18, %s681_s0 }
  0x1c   : > { %p430_p5 = scmp.lt.s32.totalorder %s428_s24, %s423_s19 }
  0x1d   : > { %p426_p12 = pnand %p425_p11, %p424_p2 }
  0x1e   : > { %p431_p7 = por %p430_p5, %p429_p0 }
  0x1f   : > { %p427_p13 = pneg %p426_p12 }
  0x21   : > { %p432_p9 = pnand %p431_p7, %p427_p13 }
  0x23   : > { %435 = shalt.err (!%p432_p9)
}
  0x24   : > { %347 = dma.hbm_to_vmem [thread:$0]  (!%p615_p10), %s134_s6, 256, %s136_s8, %s123_s17  }
  0x25   : > { %144 = sbr.rel (%p582_p8) target bundleno = 206 (0xce), region = 28  ;;  %s632_s28 = sand.u32 (!%p582_p8), 1, %s513_s10  }
  0x26   : > { %s322_s30 = sshll.u32 (!%p582_p8), %s632_s28, 4  ;;  %s147_s3 = scalar_lea.sflag (!%p582_p8), [#allocation3], %s632_s28 }
  0x27   : > { %s150_s4 = scalar_lea.vmem (!%p582_p8), [#allocation2], %s322_s30 }
  0x2a   : > { %496 = dma.done.wait (%p569_p4), %s147_s3, 256  }
  0x2b   : > { %498 = vsyncadd (%p569_p4), %s147_s3, 4294967040 }
  0x2c   : > { %500 = dma.done.wait (%p40_p1), [#allocation6], 32  }
  0x2d   : > { %502 = vsyncadd (%p40_p1), [#allocation6], 4294967264  ;;  %v177_v0 = vld [vmem:[%s150_s4] sm:$0xff]  ;;  %v178_v1 = vld [vmem:[%s150_s4 + $0x8] sm:$0xff]  ;;  %s331_s15 = sshll.u32 %s560_s13, 4  ;;  %s176_s13 = scalar_lea.vmem [#allocation7], %s322_s30 }
  0x2e   : > { %v179_v2 = vadd.f32 %v178_v1, %v177_v0  ;;  %v182_v3 = vmul.f32 %v177_v0, %v177_v0  ;;  %v183_v4 = vmul.f32 %v178_v1, %v178_v1  ;;  %v207_v19 = vld [vmem:[#allocation5] sm:$0x3]  ;;  %s229_s6 = scalar_lea.hbm %s683_s2, %s331_s15  ;;  %s231_s7 = sshll.u32 %s176_s13, 4  ;;  %s232_s7 = int_to_ptr.vmem [resolvable:$true] %s231_s7 }
  0x2f   : > { %v209_v23 = vperm.slane %v207_v19, 0  ;;  %v210_v24 = vperm.slane %v207_v19, 1  ;;  %s233_s8 = sshll.u32 %s229_s6, 4  ;;  %s218_s14 = scalar_lea.sflag [#allocation4], %s632_s28  ;;  %s234_s8 = int_to_ptr.hbm [resolvable:$true] %s233_s8 }
  0x30   : > { %180 = vadd.xlane.f32.xlu0 %v179_v2  ;;  %v184_v5 = vadd.f32 %v183_v4, %v182_v3  ;;  %s465_s17 = sshra.s32 %s234_s8, 4  ;;  %s471_s22 = scalar_lea.hbm %s683_s2, 32  ;;  %s466_s17 = int_to_ptr.hbm [resolvable:$true] %s465_s17 }
  0x31   : > { %s467_s18 = scalar_lea.hbm %s466_s17, 16  ;;  %p472_p9 = scmp.lt.s32.totalorder %s466_s17, %s683_s2 }
  0x32   : > { %p468_p1 = scmp.ne.s32.totalorder %s466_s17, %s467_s18  ;;  %p473_p10 = scmp.lt.s32.totalorder %s471_s22, %s467_s18 }
  0x34   : > { %p469_p4 = pnand %p468_p1, %p605_p3  ;;  %p474_p2 = por %p473_p10, %p472_p9 }
  0x36   : > { %p470_p8 = pneg %p469_p4 }
  0x38   : > { %185 = vadd.xlane.f32.xlu0 %v184_v5  ;;  %p475_p11 = pnand %p474_p2, %p470_p8 }
  0xa3   : > { %v181_v6 = vpop.xlane.xlu0 %180 }
  0xa4   : > { %v187_v7 = vmul.f32 0.00390625, %v181_v6 }
  0xa6   : > { %v189_v9 = vmul.f32 %v187_v7, %v187_v7  ;;  %v203_v21 = vsub.f32 %v177_v0, %v187_v7  ;;  %v204_v22 = vsub.f32 %v178_v1, %v187_v7 }
  0xab   : > { %v186_v8 = vpop.xlane.xlu0 %185 }
  0xac   : > { %v188_v10 = vmul.f32 0.00390625, %v186_v8 }
  0xae   : > { %v190_v11 = vsub.f32 %v188_v10, %v189_v9 }
  0xb0   : > { %v191_v12 = vmax.f32 %v190_v11, 0.0 }
  0xb2   : > { %v192_v13 = vadd.f32 1e-05, %v191_v12 }
  0xb4   : > { %389 = vrsqrt.f32 %v192_v13  ;;  %vm199_vm1 = vweird.f32 %v192_v13 }
  0xba   : > { %v390_v14 = vpop.eup %389 }
  0xbb   : > { %v194_v15 = vmul.f32 %v390_v14, %v192_v13  ;;  %vm200_vm0 = vweird.f32 %v390_v14 }
  0xbc   : > { %vm201_vm2 = vmor %vm199_vm1, %vm200_vm0 }
  0xbd   : > { %v195_v16 = vmul.f32 %v390_v14, %v194_v15 }
  0xbf   : > { %v196_v17 = vmul.f32 0.5, %v195_v16 }
  0xc1   : > { %v197_v18 = vsub.f32 1.5, %v196_v17 }
  0xc3   : > { %v198_v20 = vmul.f32 %v390_v14, %v197_v18 }
  0xc5   : > { %v202_v25 = vsel %vm201_vm2, %v390_v14, %v198_v20 }
  0xc6   : > { %v205_v26 = vmul.f32 %v203_v21, %v202_v25  ;;  %v206_v27 = vmul.f32 %v204_v22, %v202_v25 }
  0xc8   : > { %v213_v28 = vmul.f32 %v209_v23, %v205_v26  ;;  %v214_v29 = vmul.f32 %v210_v24, %v206_v27 }
  0xca   : > { %215 = vst [vmem:[%s176_s13] sm:$0xff] %v213_v28 }
  0xcb   : > { %216 = vst [vmem:[%s176_s13 + $0x8] sm:$0xff] %v214_v29 }
  0xcc   : > { %478 = shalt.err (!%p475_p11)
}
  0xcd   : > { %338 = dma.vmem_to_hbm [thread:$0]  (%p605_p3), %s232_s7, 256, %s234_s8, %s218_s14  }
  0xce PF: > { %s245_s29 = sand.u32 1, %s509_s9   ;;  %p689_p12 = scmp.ge.s32.totalorder %s521_s12, 2 }
  0xcf   : > { %s246_s28 = scalar_lea.sflag [#allocation4], %s245_s29 }
  0xd0   : > { %p349_p13 = pnand %p689_p12, %p574_p6 }
  0xd2   : > { %p350_p0 = pneg %p349_p13 }
  0xd4   : > { %504 = dma.done.wait (%p350_p0), %s246_s28, 256  }
  0xd5   : > { %506 = vsyncadd (%p350_p0), %s246_s28, 4294967040  ;;  %p16_p5 = scmp.ge.s32.totalorder %s592_s23, 4   ;;  %s690_s9 = smov %s513_s10 }
  0xd6   : > { %s691_s10 = smov %s517_s11  ;;  %s692_s11 = smov %s601_s26 }
  0xd7   : > { %s693_s12 = smov %s592_s23  ;;  %18 = sbr.rel (!%p16_p5) target bundleno = 6 (0x6), region = 77 }
  0xdc   :  { %252 = vsyncpa [#allocation3], 1 }
  0xdd   :  { %254 = vsyncpa [#allocation3 + $0x1], 1 }
  0xde   :  { %255 = vsyncpa [#allocation6], 1 }
  0xdf   :  { %256 = vsyncpa [#allocation4], 1 }
  0xe0   :  { %258 = vsyncpa [#allocation4 + $0x1], 1 }

</bundles_post_ra>
